<compile_context>
chip_gen: v6e
topology: v6e:2x2x1
jax: 0.10.0
libtpu: 0.0.40
codegen_flags: <defaults>
</compile_context>

<pallas_src>
import jax
import jax.numpy as jnp
from jax.experimental import pallas as pl
from jax.experimental.pallas import tpu as pltpu


def _hardswish(z):
    # hardswish(z) = z * relu6(z + 3) / 6
    return z * jnp.clip(z + 3.0, 0.0, 6.0) * (1.0 / 6.0)


def _round_up(n, m):
    return ((n + m - 1) // m) * m


# ---------------------------------------------------------------------------
# Kernel: one batch tile of  hardswish( hardswish(x@W1 + b1) @ W2 + b2 + x )
# ---------------------------------------------------------------------------
def bottleneck_kernel(x_ref, w1_ref, b1_ref, w2_ref, b2_ref, o_ref):
    x = x_ref[...].astype(jnp.float32)                   # (TB, D) f32 residual
    h = jnp.dot(x.astype(w1_ref.dtype), w1_ref[...],
                preferred_element_type=jnp.float32)      # (TB, Hp) f32 acc
    h = _hardswish(h + b1_ref[...])
    y = jnp.dot(h.astype(w2_ref.dtype), w2_ref[...],
                preferred_element_type=jnp.float32)      # (TB, D) f32 acc
    y = y + b2_ref[...] + x                              # exact-f32 residual
    o_ref[...] = _hardswish(y).astype(o_ref.dtype)


# ---------------------------------------------------------------------------
# One-time parameter prep (out of the per-call hot path).
# ---------------------------------------------------------------------------
def prepare_bottleneck_params(w1, b1, w2, b2, *, matmul_dtype=jnp.bfloat16):
    """w1: [D, H], b1: [H], w2: [H, D], b2: [D]  ([in, out] layout).

    H is zero-padded to a multiple of 128 (lane-dense intermediate); padding
    is exact because hardswish(0)=0 and the padded W2 rows are zero.
    D is left unpadded so activations travel HBM<->VMEM at their true width.
    """
    D, H = w1.shape
    Hp = _round_up(H, 128)
    w1_p = jnp.zeros((D, Hp), matmul_dtype).at[:, :H].set(w1.astype(matmul_dtype))
    b1_p = jnp.zeros((1, Hp), jnp.float32).at[0, :H].set(b1.astype(jnp.float32))
    w2_p = jnp.zeros((Hp, D), matmul_dtype).at[:H, :].set(w2.astype(matmul_dtype))
    b2_p = b2.astype(jnp.float32).reshape(1, D)
    return w1_p, b1_p, w2_p, b2_p


def _device_defaults():
    # v7x: 2 TCs/chip (want >=2 grid steps for megacore sharding) and 64 MiB
    # VMEM (smaller batch tiles).  v5e/v6e: 1 TC, 128 MiB VMEM -> bigger tiles,
    # single-step fast path at small B.
    try:
        kind = jax.devices()[0].device_kind.lower()
    except Exception:
        kind = ""
    if "v7" in kind:
        return 256, 2
    return 512, 1


def _resident_spec(shape):
    # Constant index_map: this block never changes across grid steps, so a
    # single VMEM buffer suffices (default double-buffering is wasted VMEM).
    try:
        return pl.BlockSpec(shape, lambda i: (0, 0), pipeline_mode=pl.Buffered(1))
    except TypeError:  # older jax without pipeline_mode on BlockSpec
        return pl.BlockSpec(shape, lambda i: (0, 0))


# ---------------------------------------------------------------------------
# Forward wrapper.
# ---------------------------------------------------------------------------
def bottleneck_block(x, w1_p, b1_p, w2_p, b2_p, *,
                     max_tile_b=None, min_grid_steps=None):
    """x: [B, D] (unpadded); params from prepare_bottleneck_params()."""
    B, D = x.shape
    Hp = w1_p.shape[1]
    assert w1_p.shape == (D, Hp) and w2_p.shape == (Hp, D)
    assert b1_p.shape == (1, Hp) and b2_p.shape == (1, D)

    dflt_tile, dflt_steps = _device_defaults()
    max_tile_b = dflt_tile if max_tile_b is None else max_tile_b
    min_grid_steps = dflt_steps if min_grid_steps is None else min_grid_steps

    # Batch tile: as large as allowed (amortize ~0.35us per grid step), but
    # split into >= min_grid_steps tiles so both v7x TensorCores get work.
    b8 = _round_up(B, 8)
    tile_b = min(b8, max_tile_b)
    if min_grid_steps > 1 and b8 >= 8 * min_grid_steps:
        tile_b = min(tile_b, _round_up(pl.cdiv(b8, min_grid_steps), 8))
    Bp = _round_up(B, tile_b)

    x_in = x
    if Bp != B:  # pad only the batch dim, only when actually needed
        x_in = jnp.zeros((Bp, D), x.dtype).at[:B].set(x)

    # Explicit VMEM budget: single-buffered weights/biases + double-buffered
    # x/out tiles + f32 intermediates, x2 headroom, clamped to [16, 64] MiB
    # so the same setting is safe on v7x's 64 MiB VMEM.
    bytes_w = (w1_p.size * w1_p.dtype.itemsize + w2_p.size * w2_p.dtype.itemsize
               + (b1_p.size + b2_p.size) * 4)
    bytes_io = 2 * 2 * tile_b * D * x.dtype.itemsize
    bytes_tmp = tile_b * (Hp + 2 * D) * 4
    vmem_limit = int(min(64 << 20, max(16 << 20, 2 * (bytes_w + bytes_io + bytes_tmp))))

    out = pl.pallas_call(
        bottleneck_kernel,
        out_shape=jax.ShapeDtypeStruct((Bp, D), x.dtype),
        grid_spec=pltpu.PrefetchScalarGridSpec(
            num_scalar_prefetch=0,
            grid=(Bp // tile_b,),
            in_specs=[
                pl.BlockSpec((tile_b, D), lambda i: (i, 0)),   # x tile (unpadded D)
                _resident_spec((D, Hp)),                       # W1 (VMEM-resident)
                _resident_spec((1, Hp)),                       # b1
                _resident_spec((Hp, D)),                       # W2 (VMEM-resident)
                _resident_spec((1, D)),                        # b2
            ],
            out_specs=pl.BlockSpec((tile_b, D), lambda i: (i, 0)),
        ),
        compiler_params=pltpu.CompilerParams(
            dimension_semantics=("parallel",),
            vmem_limit_bytes=vmem_limit),
    )(x_in, w1_p, b1_p, w2_p, b2_p)
    return out if Bp == B else out[:B]


# ---------------------------------------------------------------------------
# References.
# ---------------------------------------------------------------------------
def bottleneck_ref_f32(x, w1, b1, w2, b2):
    h = _hardswish(x @ w1 + b1)
    y = h @ w2 + b2
    return _hardswish(y + x)


def bottleneck_ref_matched(x, w1, b1, w2, b2, matmul_dtype=jnp.bfloat16):
    # Same numerics as the kernel: bf16 MXU inputs, f32 accumulation/epilogue.
    xc, w1c, w2c = (a.astype(matmul_dtype) for a in (x, w1, w2))
    h = _hardswish(jnp.dot(xc, w1c, preferred_element_type=jnp.float32) + b1)
    y = jnp.dot(h.astype(matmul_dtype), w2c,
                preferred_element_type=jnp.float32) + b2 + x
    return _hardswish(y)


if __name__ == "__main__":
    # Shapes implied by the module: Linear layers act on the last dim.
    B, D, FACTOR = 32, 32, 4
    H = int(D * FACTOR)  # 128

    key = jax.random.PRNGKey(0)
    kx, k1, k2, k3, k4 = jax.random.split(key, 5)

    x = jax.random.normal(kx, (B, D), dtype=jnp.float32)
    # PyTorch Linear stores [out, in]; we materialize the transposed [in, out]
    # form used by the kernel.
    w1 = jax.random.normal(k1, (D, H), dtype=jnp.float32) * (1.0 / jnp.sqrt(D))
    b1 = jax.random.normal(k2, (H,), dtype=jnp.float32) * 0.01
    w2 = jax.random.normal(k3, (H, D), dtype=jnp.float32) * (1.0 / jnp.sqrt(H))
    b2 = jax.random.normal(k4, (D,), dtype=jnp.float32) * 0.01

    # One-time parameter prep (out of the hot path).
    params = prepare_bottleneck_params(w1, b1, w2, b2)

    out = bottleneck_block(x, *params)
    out = jax.block_until_ready(out)
    assert out.shape == (B, D) and out.dtype == x.dtype

    # Tight check vs a reference using the same bf16-matmul numerics.
    ref_m = bottleneck_ref_matched(x, w1, b1, w2, b2)
    assert jnp.allclose(out, ref_m, atol=2e-3, rtol=2e-3), "mismatch vs matched ref"

    # Sanity check vs the full-f32 module semantics (bf16 MXU precision).
    ref_f = bottleneck_ref_f32(x, w1, b1, w2, b2)
    assert jnp.allclose(out, ref_f, atol=1e-1, rtol=1e-1), "mismatch vs f32 ref"

    print("KERNEL_OK")
</pallas_src>

<mosaic_0001>
module attributes {stable_mosaic.version = 11 : i64} {
  func.func @bottleneck_kernel(%arg0: i32, %arg1: memref<32x32xf32, #tpu.memory_space<vmem>>, %arg2: memref<32x128xbf16, #tpu.memory_space<vmem>>, %arg3: memref<1x128xf32, #tpu.memory_space<vmem>>, %arg4: memref<128x32xbf16, #tpu.memory_space<vmem>>, %arg5: memref<1x32xf32, #tpu.memory_space<vmem>>, %arg6: memref<32x32xf32, #tpu.memory_space<vmem>>) attributes {dimension_semantics = [#tpu.dimension_semantics<parallel>], iteration_bounds = array<i64: 1>, scalar_prefetch = 0 : i64, scratch_operands = 0 : i64, tpu.core_type = #tpu.core_type<tc>, window_params = [{transform_indices = @transform_0, window_bounds = array<i64: 32, 32>}, {pipeline_mode = #tpu.pipeline_mode<synchronous>, transform_indices = @transform_1, window_bounds = array<i64: 32, 128>}, {pipeline_mode = #tpu.pipeline_mode<synchronous>, transform_indices = @transform_2, window_bounds = array<i64: 1, 128>}, {pipeline_mode = #tpu.pipeline_mode<synchronous>, transform_indices = @transform_3, window_bounds = array<i64: 128, 32>}, {pipeline_mode = #tpu.pipeline_mode<synchronous>, transform_indices = @transform_4, window_bounds = array<i64: 1, 32>}, {transform_indices = @transform_5, window_bounds = array<i64: 32, 32>}]} {
    %c0 = arith.constant 0 : index
    %c0_0 = arith.constant 0 : index
    %0 = vector.load %arg1[%c0, %c0_0] : memref<32x32xf32, #tpu.memory_space<vmem>>, vector<32x32xf32>
    %1 = arith.truncf %0 : vector<32x32xf32> to vector<32x32xbf16>
    %c0_1 = arith.constant 0 : index
    %c0_2 = arith.constant 0 : index
    %2 = vector.load %arg2[%c0_1, %c0_2] : memref<32x128xbf16, #tpu.memory_space<vmem>>, vector<32x128xbf16>
    %cst = arith.constant dense<0.000000e+00> : vector<32x128xf32>
    %3 = tpu.matmul %1, %2, %cst {dimension_numbers = #tpu.dot_dimension_numbers<[1], [0], [0], [1], [0, 0, 1, 1], [], []>} : vector<32x32xbf16>, vector<32x128xbf16>, vector<32x128xf32> -> vector<32x128xf32>
    %c0_3 = arith.constant 0 : index
    %c0_4 = arith.constant 0 : index
    %4 = vector.load %arg3[%c0_3, %c0_4] : memref<1x128xf32, #tpu.memory_space<vmem>>, vector<1x128xf32>
    %5 = vector.broadcast %4 : vector<1x128xf32> to vector<32x128xf32>
    %6 = arith.addf %3, %5 : vector<32x128xf32>
    %cst_5 = arith.constant 3.000000e+00 : f32
    %7 = vector.broadcast %cst_5 : f32 to vector<32x128xf32>
    %8 = arith.addf %6, %7 : vector<32x128xf32>
    %cst_6 = arith.constant 0.000000e+00 : f32
    %cst_7 = arith.constant 6.000000e+00 : f32
    %9 = vector.broadcast %cst_6 : f32 to vector<32x128xf32>
    %10 = arith.maximumf %9, %8 : vector<32x128xf32>
    %11 = vector.broadcast %cst_7 : f32 to vector<32x128xf32>
    %12 = arith.minimumf %11, %10 : vector<32x128xf32>
    %13 = arith.mulf %6, %12 : vector<32x128xf32>
    %cst_8 = arith.constant 0.166666672 : f32
    %14 = vector.broadcast %cst_8 : f32 to vector<32x128xf32>
    %15 = arith.mulf %13, %14 : vector<32x128xf32>
    %16 = arith.truncf %15 : vector<32x128xf32> to vector<32x128xbf16>
    %c0_9 = arith.constant 0 : index
    %c0_10 = arith.constant 0 : index
    %17 = vector.load %arg4[%c0_9, %c0_10] : memref<128x32xbf16, #tpu.memory_space<vmem>>, vector<128x32xbf16>
    %cst_11 = arith.constant dense<0.000000e+00> : vector<32x32xf32>
    %18 = tpu.matmul %16, %17, %cst_11 {dimension_numbers = #tpu.dot_dimension_numbers<[1], [0], [0], [1], [0, 0, 1, 1], [], []>} : vector<32x128xbf16>, vector<128x32xbf16>, vector<32x32xf32> -> vector<32x32xf32>
    %c0_12 = arith.constant 0 : index
    %c0_13 = arith.constant 0 : index
    %19 = vector.load %arg5[%c0_12, %c0_13] : memref<1x32xf32, #tpu.memory_space<vmem>>, vector<1x32xf32>
    %20 = vector.broadcast %19 : vector<1x32xf32> to vector<32x32xf32>
    %21 = arith.addf %18, %20 : vector<32x32xf32>
    %22 = arith.addf %21, %0 : vector<32x32xf32>
    %cst_14 = arith.constant 3.000000e+00 : f32
    %23 = vector.broadcast %cst_14 : f32 to vector<32x32xf32>
    %24 = arith.addf %22, %23 : vector<32x32xf32>
    %cst_15 = arith.constant 0.000000e+00 : f32
    %cst_16 = arith.constant 6.000000e+00 : f32
    %25 = vector.broadcast %cst_15 : f32 to vector<32x32xf32>
    %26 = arith.maximumf %25, %24 : vector<32x32xf32>
    %27 = vector.broadcast %cst_16 : f32 to vector<32x32xf32>
    %28 = arith.minimumf %27, %26 : vector<32x32xf32>
    %29 = arith.mulf %22, %28 : vector<32x32xf32>
    %cst_17 = arith.constant 0.166666672 : f32
    %30 = vector.broadcast %cst_17 : f32 to vector<32x32xf32>
    %31 = arith.mulf %29, %30 : vector<32x32xf32>
    %c0_18 = arith.constant 0 : index
    %c0_19 = arith.constant 0 : index
    %32 = vector.load %arg6[%c0_18, %c0_19] : memref<32x32xf32, #tpu.memory_space<vmem>>, vector<32x32xf32>
    tpu.vector_store %arg6[%c0_18, %c0_19], %31 {strides = array<i32>} : memref<32x32xf32, #tpu.memory_space<vmem>>, vector<32x32xf32>,
    return
  }
  func.func @transform_0(%arg0: i32) -> (i32, i32) {
    %c0_i32 = arith.constant 0 : i32
    %c0_i32_0 = arith.constant 0 : i32
    return %arg0, %c0_i32 : i32, i32
  }
  func.func @transform_1(%arg0: i32) -> (i32, i32) {
    %c0_i32 = arith.constant 0 : i32
    %c0_i32_0 = arith.constant 0 : i32
    %c0_i32_1 = arith.constant 0 : i32
    return %c0_i32, %c0_i32_0 : i32, i32
  }
  func.func @transform_2(%arg0: i32) -> (i32, i32) {
    %c0_i32 = arith.constant 0 : i32
    %c0_i32_0 = arith.constant 0 : i32
    %c0_i32_1 = arith.constant 0 : i32
    return %c0_i32, %c0_i32_0 : i32, i32
  }
  func.func @transform_3(%arg0: i32) -> (i32, i32) {
    %c0_i32 = arith.constant 0 : i32
    %c0_i32_0 = arith.constant 0 : i32
    %c0_i32_1 = arith.constant 0 : i32
    return %c0_i32, %c0_i32_0 : i32, i32
  }
  func.func @transform_4(%arg0: i32) -> (i32, i32) {
    %c0_i32 = arith.constant 0 : i32
    %c0_i32_0 = arith.constant 0 : i32
    %c0_i32_1 = arith.constant 0 : i32
    return %c0_i32, %c0_i32_0 : i32, i32
  }
  func.func @transform_5(%arg0: i32) -> (i32, i32) {
    %c0_i32 = arith.constant 0 : i32
    %c0_i32_0 = arith.constant 0 : i32
    return %arg0, %c0_i32 : i32, i32
  }
}

</mosaic_0001>

<bundles_post_ra>
// kernel: tpu_custom_call.1
= control target key start
LH: loop header
LB: loop body
LE: loop exit
PB: predicated region body
PF: predicated region fallthrough
CT: control target
= control target key end

     0   :  { %vm51_vm0 = vcmask 261120   ;;  %s490_s0 = inlined_call_operand.vmem [shape: f32[32,32], index: 0, kind: input, shape index: {}]   ;;  %s491_s1 = inlined_call_operand.vmem [shape: bf16[32,128], index: 1, kind: input, shape index: {}]   ;;  %s492_s2 = inlined_call_operand.vmem [shape: f32[1,128], index: 2, kind: input, shape index: {}]   ;;  %s493_s3 = inlined_call_operand.vmem [shape: bf16[128,32], index: 3, kind: input, shape index: {}]   ;;  %s494_s4 = inlined_call_operand.vmem [shape: f32[1,32], index: 4, kind: input, shape index: {}]   ;;  %s495_s5 = inlined_call_operand.hbm [shape: f32[32,32], index: 5, kind: output, shape index: {}]  }
   0x1   :  { %v352_v0 = vld [vmem:[%s491_s1 + $0x8] sm:$0xff]   ;;  %v353_v1 = vld [vmem:[%s491_s1] sm:$0xff]   ;;  %v436_v4 = vld [vmem:[%s490_s0 + $0x10] sm:$0xff] }
   0x2   :  { %321 = vmatprep.subr.bf16.mxu0 %v352_v0  ;;  %v426_v2 = vld [vmem:[%s490_s0] sm:$0xff]  ;;  %v431_v3 = vld [vmem:[%s490_s0 + $0x8] sm:$0xff]  ;;  %v443_v6 = vld [vmem:[%s490_s0 + $0x18] sm:$0xff] }
   0x3   :  { %322 = vmatpush3.bf16.msra.mxu0 %v352_v0  ;;  %v26_v5 = vpack.c.bf16 %v431_v3, %v426_v2  ;;  %v354_v7 = vld [vmem:[%s493_s3 + $0x38] sm:$0xff]   ;;  %v355_v8 = vld [vmem:[%s493_s3 + $0x30] sm:$0xff]   ;;  %v27_v9 = vpack.c.bf16 %v443_v6, %v436_v4  ;;  %v356_v10 = vld [vmem:[%s493_s3 + $0x28] sm:$0xff]  }
   0x4   :  { %323 = vmatprep.subr.bf16.mxu0 %v353_v1  ;;  %329 = vmatprep.subr.bf16.mxu1 %v354_v7 }
   0x5   :  { %325 = vmatprep.mubr.msk.bf16.mxu0 %vm51_vm0, %v26_v5  ;;  %330 = vmatpush3.bf16.msra.mxu1 %v354_v7 }
   0x6   :  { %331 = vmatprep.subr.bf16.mxu1 %v355_v8 }
   0x7   :  { %324 = vmatpush3.bf16.msra.mxu0 %v353_v1 }
   0x8   :  { %10 = vsyncpa [#allocation3], 0  ;;  %v357_v11 = vld [vmem:[%s493_s3 + $0x20] sm:$0xff]   ;;  %v358_v12 = vld [vmem:[%s493_s3 + $0x18] sm:$0xff]  }
   0x9   :  { %332 = vmatpush3.bf16.msra.mxu1 %v355_v8  ;;  %v359_v13 = vld [vmem:[%s493_s3 + $0x10] sm:$0xff]   ;;  %v360_v14 = vld [vmem:[%s493_s3 + $0x8] sm:$0xff]   ;;  %v361_v15 = vld [vmem:[%s493_s3] sm:$0xff]  }
   0xa   :  { %326 = vmatmul.mubr.msk.bf16.vlgmr.msra.gmra.mxu0 %vm51_vm0, %v27_v9  ;;  %333 = vmatprep.subr.bf16.mxu1 %v356_v10  ;;  %v293_v16 = vld [vmem:[%s492_s2] ss:$0 sm:$0xff] }
   0xb   :  { %v298_v47 = vld [vmem:[%s494_s4] ss:$0 sm:$0xff]  ;;  %s384_s4 = smov [#allocation2]  }
   0xc   :  { %s282_s21 = sshll.u32 %s384_s4, 4  ;;  %s283_s21 = int_to_ptr.vmem [resolvable:$true] %s282_s21 }
   0xd   :  { %334 = vmatpush3.bf16.msra.mxu1 %v356_v10  ;;  %s362_s22 = scalar_lea.vmem %s283_s21, 512  ;;  %p367_p1 = scmp.lt.s32.totalorder %s283_s21, %s283_s21 }
   0xe   :  { %335 = vmatprep.subr.bf16.mxu1 %v357_v11  ;;  %p363_p0 = scmp.ne.s32.totalorder %s283_s21, %s362_s22  ;;  %p368_p2 = scmp.lt.s32.totalorder %s362_s22, %s362_s22 }
  0x10   :  { %p369_p3 = por %p368_p2, %p367_p1 }
  0x11   :  { %336 = vmatpush3.bf16.msra.mxu1 %v357_v11 }
  0x12   :  { %337 = vmatprep.subr.bf16.mxu1 %v358_v12  ;;  %p370_p4 = pnand %p369_p3, %p363_p0 }
  0x15   :  { %338 = vmatpush3.bf16.msra.mxu1 %v358_v12 }
  0x16   :  { %339 = vmatprep.subr.bf16.mxu1 %v359_v13 }
  0x19   :  { %340 = vmatpush3.bf16.msra.mxu1 %v359_v13 }
  0x1a   :  { %341 = vmatprep.subr.bf16.mxu1 %v360_v14 }
  0x1d   :  { %342 = vmatpush3.bf16.msra.mxu1 %v360_v14 }
  0x1e   :  { %343 = vmatprep.subr.bf16.mxu1 %v361_v15 }
  0x21   :  { %344 = vmatpush3.bf16.msra.mxu1 %v361_v15 }
  0xca   :  { %v327_v17 = vpop.f32.mrf.mxu0 }
  0xcb   :  { %v101_v18 = vadd.f32 %v327_v17, %v293_v16 }
  0xcc   :  { %v92_v19 = vpop.f32.mrf.mxu0 }
  0xcd   :  { %v109_v20 = vadd.f32 3.0, %v101_v18  ;;  %v93_v21 = vadd.f32 %v293_v16, %v92_v19 }
  0xce   :  { %v328_v22 = vpop.f32.mrf.mxu0 }
  0xcf   :  { %v107_v23 = vadd.f32 3.0, %v93_v21  ;;  %v104_v24 = vadd.f32 %v328_v22, %v293_v16  ;;  %v113_v25 = vmax.f32 %v109_v20, 0.0 }
  0xd0   :  { %v95_v26 = vpop.f32.mrf.mxu0 }
  0xd1   :  { %v111_v27 = vmax.f32 %v107_v23, 0.0  ;;  %v110_v28 = vadd.f32 3.0, %v104_v24  ;;  %v96_v29 = vadd.f32 %v293_v16, %v95_v26  ;;  %v117_v33 = vmin.f32 %v113_v25, 6.0 }
  0xd3   :  { %v115_v30 = vmin.f32 %v111_v27, 6.0  ;;  %v114_v31 = vmax.f32 %v110_v28, 0.0  ;;  %v108_v32 = vadd.f32 3.0, %v96_v29  ;;  %v121_v39 = vmul.f32 %v117_v33, %v101_v18 }
  0xd5   :  { %v118_v34 = vmin.f32 %v114_v31, 6.0  ;;  %v112_v35 = vmax.f32 %v108_v32, 0.0  ;;  %v119_v38 = vmul.f32 %v115_v30, %v93_v21  ;;  %v125_v44 = vmul.f32 0.16666667, %v121_v39 }
  0xd7   :  { %v122_v36 = vmul.f32 %v118_v34, %v104_v24  ;;  %v116_v37 = vmin.f32 %v112_v35, 6.0  ;;  %v123_v42 = vmul.f32 0.16666667, %v119_v38 }
  0xd9   :  { %v120_v40 = vmul.f32 %v116_v37, %v96_v29  ;;  %v126_v41 = vmul.f32 0.16666667, %v122_v36 }
  0xdb   :  { %v124_v43 = vmul.f32 0.16666667, %v120_v40  ;;  %v128_v46 = vpack.c.bf16 %v126_v41, %v125_v44 }
  0xdd   :  { %v127_v45 = vpack.c.bf16 %v124_v43, %v123_v42 }
  0xdf   :  { %345 = vmatprep.mubr.bf16.mxu1 %v127_v45 }
  0xe0   :  { %346 = vmatmul.mubr.bf16.vlgmr.msra.gmra.mxu1 %v128_v46 }
 0x1a0   :  { %v347_v48 = vpop.f32.mrf.mxu1 }
 0x1a1   :  { %v243_v49 = vadd.f32 %v347_v48, %v298_v47 }
 0x1a2   :  { %v234_v50 = vpop.f32.mrf.mxu1 }
 0x1a3   :  { %v251_v51 = vadd.f32 %v243_v49, %v436_v4  ;;  %v235_v52 = vadd.f32 %v298_v47, %v234_v50 }
 0x1a4   :  { %v348_v53 = vpop.f32.mrf.mxu1 }
 0x1a5   :  { %v255_v54 = vadd.f32 3.0, %v251_v51  ;;  %v249_v55 = vadd.f32 %v235_v52, %v426_v2  ;;  %v246_v56 = vadd.f32 %v348_v53, %v298_v47 }
 0x1a6   :  { %v237_v57 = vpop.f32.mrf.mxu1 }
 0x1a7   :  { %v259_v58 = vmax.f32 %v255_v54, 0.0  ;;  %v253_v59 = vadd.f32 3.0, %v249_v55  ;;  %v252_v60 = vadd.f32 %v246_v56, %v443_v6  ;;  %v238_v61 = vadd.f32 %v298_v47, %v237_v57 }
 0x1a9   :  { %v263_v62 = vmin.f32 %v259_v58, 6.0  ;;  %v257_v63 = vmax.f32 %v253_v59, 0.0  ;;  %v256_v0 = vadd.f32 3.0, %v252_v60  ;;  %v250_v1 = vadd.f32 %v238_v61, %v431_v3 }
 0x1ab   :  { %v267_v5 = vmul.f32 %v263_v62, %v251_v51  ;;  %v261_v7 = vmin.f32 %v257_v63, 6.0  ;;  %v260_v4 = vmax.f32 %v256_v0, 0.0  ;;  %v254_v8 = vadd.f32 3.0, %v250_v1 }
 0x1ad   :  { %v271_v9 = vmul.f32 0.16666667, %v267_v5  ;;  %v265_v10 = vmul.f32 %v261_v7, %v249_v55  ;;  %v264_v11 = vmin.f32 %v260_v4, 6.0  ;;  %v258_v2 = vmax.f32 %v254_v8, 0.0 }
 0x1af   :  { %275 = vst.msk [vmem:[#allocation2 + $0x10] sm:$0xff] %vm51_vm0, %v271_v9  ;;  %v269_v12 = vmul.f32 0.16666667, %v265_v10  ;;  %v268_v13 = vmul.f32 %v264_v11, %v252_v60  ;;  %v262_v14 = vmin.f32 %v258_v2, 6.0 }
 0x1b1   :  { %273 = vst.msk [vmem:[#allocation2] sm:$0xff] %vm51_vm0, %v269_v12  ;;  %v272_v6 = vmul.f32 0.16666667, %v268_v13  ;;  %v266_v15 = vmul.f32 %v262_v14, %v250_v1 }
 0x1b3   :  { %276 = vst.msk [vmem:[#allocation2 + $0x18] sm:$0xff] %vm51_vm0, %v272_v6  ;;  %v270_v3 = vmul.f32 0.16666667, %v266_v15 }
 0x1b5   :  { %274 = vst.msk [vmem:[#allocation2 + $0x8] sm:$0xff] %vm51_vm0, %v270_v3 }
 0x1b6   :  { %373 = shalt.err (!%p370_p4)
}
 0x1b7   :  { %s385_s23 = smov 128   ;;  %s386_s24 = smov 8  }
 0x1b8   :  { %288 = dma.vmem_to_hbm [thread:$0]  %s283_s21, 512, %s495_s5, [#allocation3], %s385_s23, %s385_s23, %s386_s24  }
 0x1b9   :  { %382 = dma.done.wait [#allocation3], 512  }
 0x1ba   :  { %383 = vsyncadd [#allocation3], 4294966784 }
 0x1bb   :  { %292 = vsyncpa [#allocation3], 1 }

</bundles_post_ra>
